<compile_context>
chip_gen: v7x
topology: tpu7x:2x2x1
jax: 0.10.0
libtpu: 0.0.40
codegen_flags: <defaults>
</compile_context>

<pallas_src>
import functools

import jax
import jax.numpy as jnp
import numpy as np
from jax import lax
from jax.experimental import pallas as pl
from jax.experimental.pallas import tpu as pltpu

_LANE = 128


def _round_up(x, m):
    return ((x + m - 1) // m) * m


def _log_sigmoid(x):
    # Numerically stable: logsigmoid(x) = min(x, 0) - log1p(exp(-|x|))
    return jnp.minimum(x, 0.0) - jnp.log1p(jnp.exp(-jnp.abs(x)))


def _default_tile_cap():
    """Batch-tile cap: 256 fills the 256-wide MXU on v6e/v7x; 128 is the safe choice
    elsewhere (v5e: 128-wide MXU, single vst slot -> bigger tiles spill)."""
    try:
        kind = jax.devices()[0].device_kind.lower()
        if ("v6" in kind) or ("v7" in kind):
            return 256
    except Exception:
        pass
    return 128


def prepare_tables(u_table, v_table, *, table_dtype=jnp.bfloat16):
    """Pad vocab to a multiple of 128 (lane-dense one-hot contraction dim) and cast the
    tables to the MXU-friendly dtype.  Call ONCE at init, not per forward step.  D is left
    unpadded: the table block's last dim equals the full array extent (allowed by the
    (8,128) rule) and Mosaic lane-pads the resident tile internally for free."""
    vocab, dim = u_table.shape
    vp = _round_up(vocab, _LANE)
    pad = ((0, vp - vocab), (0, 0))
    u_tab = jnp.pad(u_table, pad).astype(table_dtype)
    v_tab = jnp.pad(v_table, pad).astype(table_dtype)
    return u_tab, v_tab


def skipgram_loss_kernel(ids_ref, u_tab_ref, v_tab_ref, out_ref, *, n_neg, valid_rows):
    """One batch tile per grid step.

    ids_ref   : (tb, 2+N) int32  packed [u_pos | v_pos | v_neg]
    u_tab_ref : (Vp, D)          u_embeddings table (zero padded, resident)
    v_tab_ref : (Vp, D)          v_embeddings table (zero padded, resident)
    out_ref   : (1, 8, 128) f32  lane-dense per-tile partial sum (same value replicated)
    """
    tb = ids_ref.shape[0]
    vp = u_tab_ref.shape[0]
    compute_dtype = u_tab_ref.dtype      # bf16 feeds the MXU natively; f32 also works

    ids = ids_ref[...]                                          # (tb, 2+N) int32
    u_ids = ids[:, 0:1]                                         # (tb, 1)
    v_ids = ids[:, 1:2]                                         # (tb, 1)

    # Hoisted lane iota, shared by every compare (JAX does not CSE broadcasts).
    lanes = lax.broadcasted_iota(jnp.int32, (1, vp), 1)         # (1, Vp)

    # In-kernel gather via one-hot @ table (small-vocab path; padded rows never hit).
    u_onehot = (u_ids == lanes).astype(compute_dtype)           # (tb, Vp)
    v_onehot = (v_ids == lanes).astype(compute_dtype)           # (tb, Vp)

    # counts[b, w] = #{ n : v_neg[b, n] == w }  =>  sum_n v_table[v_neg[b, n]] = counts @ v_table
    # Accumulate compares in int32; single cast to the MXU dtype at the end.
    counts_i32 = jnp.zeros((tb, vp), jnp.int32)
    for n in range(n_neg):                                      # static, small trip count
        counts_i32 = counts_i32 + (ids[:, 2 + n:3 + n] == lanes).astype(jnp.int32)
    counts = counts_i32.astype(compute_dtype)                   # (tb, Vp), exact (<= N)

    u_tab = u_tab_ref[...]                                      # (Vp, D)
    v_tab = v_tab_ref[...]                                      # (Vp, D)

    eu = jnp.dot(u_onehot, u_tab, preferred_element_type=jnp.float32)      # (tb, D)
    # One fused MXU dispatch for both v-side gathers: [ev rows ; sum_n env rows].
    v_lhs = jnp.concatenate([v_onehot, counts], axis=0)                    # (2*tb, Vp)
    v_out = jnp.dot(v_lhs, v_tab, preferred_element_type=jnp.float32)      # (2*tb, D)
    ev, env_sum = v_out[:tb], v_out[tb:]

    score = jnp.sum(eu * ev, axis=1, keepdims=True)             # (tb, 1)
    # Reference sums the N dot products BEFORE the logsigmoid (bmm(...).sum(1)):
    #   neg_score = (sum_n v_tab[neg_n]) . eu
    neg_score = jnp.sum(env_sum * eu, axis=1, keepdims=True)    # (tb, 1)

    loss_rows = _log_sigmoid(score) + _log_sigmoid(-neg_score)  # (tb, 1), f32

    if valid_rows is not None:  # compile-time branch: mask padded batch rows
        row = lax.broadcasted_iota(jnp.int32, (tb, 1), 0) + pl.program_id(0) * tb
        loss_rows = jnp.where(row < valid_rows, loss_rows, jnp.float32(0.0))

    partial = jnp.sum(loss_rows, axis=0, keepdims=True)         # (1, 1)
    out_ref[...] = jnp.broadcast_to(partial.reshape(1, 1, 1), out_ref.shape)


def _table_block_spec(vp, dim, single_buffer):
    """Resident (constant index_map) table spec; single-buffered when supported so two
    tables don't double their VMEM footprint (matters at real vocab sizes on v7x)."""
    index_map = lambda i: (0, 0)
    if single_buffer:
        try:
            return pl.BlockSpec((vp, dim), index_map, pipeline_mode=pl.Buffered(1))
        except (AttributeError, TypeError):
            pass
    return pl.BlockSpec((vp, dim), index_map)


def _vmem_limit_bytes(vp, dim, tb, n_ids, table_itemsize, table_buffers):
    table_bytes = 2 * vp * dim * table_itemsize * table_buffers
    ids_bytes = 2 * tb * n_ids * 4                 # double-buffered id tile
    out_bytes = 2 * 8 * 128 * 4                    # double-buffered partial-sum tile
    work_bytes = 4 * tb * vp * 4                   # one-hots / counts / stacked-lhs headroom
    need = table_bytes + ids_bytes + out_bytes + work_bytes + (2 << 20)
    # Clamp to something every generation's physical VMEM can hold (v7x: 64 MiB).
    return int(min(max(need, 16 << 20), 64 << 20))


def skipgram_forward(u_tab, v_tab, u_pos, v_pos, v_neg, batch_size, *, tb=None):
    """Fused forward pass of the PyTorch `skipgram` module.

    `u_tab` / `v_tab` must come from `prepare_tables` (pad/cast hoisted out of the
    per-call path).  Normalization uses the caller-provided batch_size, faithful to
    the module (normally batch_size == u_pos.shape[0]).
    """
    vp, dim = u_tab.shape
    assert v_tab.shape == (vp, dim)
    batch = int(u_pos.shape[0])
    n_neg = int(v_neg.shape[1])
    n_ids = 2 + n_neg

    if tb is None:
        tb = min(batch, _default_tile_cap())
    assert tb == batch or tb % 8 == 0, "batch tile must be the full batch or a multiple of 8"

    padded_batch = _round_up(batch, tb)
    num_tiles = padded_batch // tb
    valid_rows = batch if padded_batch != batch else None   # None => no masking needed

    # Pack [u_pos | v_pos | v_neg] -> one (B, 2+N) int32 input, one DMA per grid step.
    ids = jnp.concatenate(
        [u_pos.reshape(batch, 1).astype(jnp.int32),
         v_pos.reshape(batch, 1).astype(jnp.int32),
         v_neg.reshape(batch, n_neg).astype(jnp.int32)], axis=1)
    if padded_batch != batch:
        ids = jnp.pad(ids, ((0, padded_batch - batch), (0, 0)))   # padded rows masked in-kernel

    kernel = functools.partial(skipgram_loss_kernel, n_neg=n_neg, valid_rows=valid_rows)

    # TODO(synk): for large vocabularies (tables >> VMEM) replace the resident-table
    # one-hot gather with a manual row gather (tables at memory_space=pl.ANY +
    # pltpu.make_async_copy double-buffering).
    def build(single_buffer_tables):
        return pl.pallas_call(
            kernel,
            out_shape=jax.ShapeDtypeStruct((num_tiles, 8, 128), jnp.float32),
            grid_spec=pltpu.PrefetchScalarGridSpec(
                num_scalar_prefetch=0,
                grid=(num_tiles,),
                in_specs=[
                    pl.BlockSpec((tb, n_ids), lambda i: (i, 0)),            # packed ids
                    _table_block_spec(vp, dim, single_buffer_tables),        # u table (resident)
                    _table_block_spec(vp, dim, single_buffer_tables),        # v table (resident)
                ],
                out_specs=pl.BlockSpec((1, 8, 128), lambda i: (i, 0, 0)),    # per-tile partial sum
            ),
            compiler_params=pltpu.CompilerParams(
                # Tiles are independent -> shard across v7x's two TensorCores.
                dimension_semantics=("parallel",),
                vmem_limit_bytes=_vmem_limit_bytes(
                    vp, dim, tb, n_ids, u_tab.dtype.itemsize,
                    1 if single_buffer_tables else 2),
            ),
        )

    try:
        partials = build(True)(ids, u_tab, v_tab)
    except Exception:
        # pl.Buffered(1) rejected by this jax/libtpu build: fall back to default buffering.
        partials = build(False)(ids, u_tab, v_tab)

    total = jnp.sum(partials[:, 0, 0])
    return -total / jnp.float32(batch_size)


def skipgram_reference(u_table, v_table, u_pos, v_pos, v_neg, batch_size):
    """Pure-JAX mirror of the PyTorch forward (for a correctness check)."""
    eu = u_table[u_pos]                                   # (B, D)
    ev = v_table[v_pos]                                   # (B, D)
    env = v_table[v_neg]                                  # (B, N, D)
    score = jnp.sum(eu * ev, axis=1)                      # (B,)
    log_target = jax.nn.log_sigmoid(score)
    neg_score = jnp.sum(jnp.einsum("bnd,bd->bn", env, eu), axis=1)
    sum_log_sampled = jax.nn.log_sigmoid(-neg_score)
    return -jnp.sum(log_target + sum_log_sampled) / batch_size


if __name__ == "__main__":
    vocab_size = 50
    embedding_dim = 32
    batch = 16
    n_neg = 8

    key = jax.random.PRNGKey(0)
    k_u, k_v2, k_up, k_vp, k_vn, k_b = jax.random.split(key, 6)

    # Parameter init mirrors skipgram.init_emb():
    #   u_embeddings ~ U(-0.5/D, 0.5/D);  v_embeddings = 0
    initrange = 0.5 / embedding_dim
    u_table = jax.random.uniform(
        k_u, (vocab_size, embedding_dim), jnp.float32, -initrange, initrange)
    v_table = jnp.zeros((vocab_size, embedding_dim), jnp.float32)

    u_pos = jax.random.randint(k_up, (batch,), 0, vocab_size, jnp.int32)
    v_pos = jax.random.randint(k_vp, (batch,), 0, vocab_size, jnp.int32)
    v_neg = jax.random.randint(k_vn, (batch, n_neg), 0, vocab_size, jnp.int32)

    # 1) module-faithful init (v table is zeros), bf16 MXU path
    u_tab, v_tab = prepare_tables(u_table, v_table)          # hoisted pad/cast (once)
    loss = skipgram_forward(u_tab, v_tab, u_pos, v_pos, v_neg, batch)
    jax.block_until_ready(loss)
    ref = skipgram_reference(u_table, v_table, u_pos, v_pos, v_neg, batch)
    np.testing.assert_allclose(np.asarray(loss), np.asarray(ref), rtol=5e-3, atol=5e-3)

    # 2) non-zero v table to exercise the positive/negative score paths (bf16 tables;
    #    tolerance accounts for bf16 quantization of the table values)
    v_table2 = jax.random.uniform(
        k_v2, (vocab_size, embedding_dim), jnp.float32, -initrange, initrange)
    u_tab2, v_tab2 = prepare_tables(u_table, v_table2)
    loss2 = skipgram_forward(u_tab2, v_tab2, u_pos, v_pos, v_neg, batch)
    jax.block_until_ready(loss2)
    ref2 = skipgram_reference(u_table, v_table2, u_pos, v_pos, v_neg, batch)
    np.testing.assert_allclose(np.asarray(loss2), np.asarray(ref2), rtol=5e-3, atol=5e-3)

    # 3) f32 table path (no bf16 rounding of the embeddings)
    u_tab3, v_tab3 = prepare_tables(u_table, v_table2, table_dtype=jnp.float32)
    loss3 = skipgram_forward(u_tab3, v_tab3, u_pos, v_pos, v_neg, batch)
    jax.block_until_ready(loss3)
    np.testing.assert_allclose(np.asarray(loss3), np.asarray(ref2), rtol=2e-3, atol=2e-3)

    # 4) batch larger than the tile -> multi-tile "parallel" grid with padded+masked rows
    big_batch = 200
    kb1, kb2, kb3 = jax.random.split(k_b, 3)
    u_pos_b = jax.random.randint(kb1, (big_batch,), 0, vocab_size, jnp.int32)
    v_pos_b = jax.random.randint(kb2, (big_batch,), 0, vocab_size, jnp.int32)
    v_neg_b = jax.random.randint(kb3, (big_batch, n_neg), 0, vocab_size, jnp.int32)
    loss4 = skipgram_forward(u_tab2, v_tab2, u_pos_b, v_pos_b, v_neg_b, big_batch, tb=64)
    jax.block_until_ready(loss4)
    ref4 = skipgram_reference(u_table, v_table2, u_pos_b, v_pos_b, v_neg_b, big_batch)
    np.testing.assert_allclose(np.asarray(loss4), np.asarray(ref4), rtol=5e-3, atol=5e-3)

    print("KERNEL_OK")
</pallas_src>

<mosaic_0001>
module attributes {stable_mosaic.version = 11 : i64} {
  func.func @skipgram_loss_kernel(%arg0: i32, %arg1: memref<16x10xi32, #tpu.memory_space<vmem>>, %arg2: memref<128x32xbf16, #tpu.memory_space<vmem>>, %arg3: memref<128x32xbf16, #tpu.memory_space<vmem>>, %arg4: memref<1x8x128xf32, #tpu.memory_space<vmem>>) attributes {dimension_semantics = [#tpu.dimension_semantics<parallel>], iteration_bounds = array<i64: 1>, scalar_prefetch = 0 : i64, scratch_operands = 0 : i64, tpu.core_type = #tpu.core_type<tc>, window_params = [{transform_indices = @transform_0, window_bounds = array<i64: 16, 10>}, {pipeline_mode = #tpu.pipeline_mode<synchronous>, transform_indices = @transform_1, window_bounds = array<i64: 128, 32>}, {pipeline_mode = #tpu.pipeline_mode<synchronous>, transform_indices = @transform_2, window_bounds = array<i64: 128, 32>}, {transform_indices = @transform_3, window_bounds = array<i64: 1, 8, 128>}]} {
    %c0 = arith.constant 0 : index
    %c0_0 = arith.constant 0 : index
    %0 = vector.load %arg1[%c0, %c0_0] : memref<16x10xi32, #tpu.memory_space<vmem>>, vector<16x10xi32>
    %1 = vector.extract_strided_slice %0 {offsets = [0, 0], sizes = [16, 1], strides = [1, 1]} : vector<16x10xi32> to vector<16x1xi32>
    %2 = vector.extract_strided_slice %0 {offsets = [0, 1], sizes = [16, 1], strides = [1, 1]} : vector<16x10xi32> to vector<16x1xi32>
    %3 = tpu.iota {dimensions = array<i32: 1>} : vector<1x128xi32>
    %4 = vector.broadcast %1 : vector<16x1xi32> to vector<16x128xi32>
    %5 = vector.broadcast %3 : vector<1x128xi32> to vector<16x128xi32>
    %6 = arith.cmpi eq, %4, %5 : vector<16x128xi32>
    %7 = arith.extui %6 : vector<16x128xi1> to vector<16x128xi32>
    %8 = arith.sitofp %7 : vector<16x128xi32> to vector<16x128xf32>
    %9 = arith.truncf %8 : vector<16x128xf32> to vector<16x128xbf16>
    %10 = vector.broadcast %2 : vector<16x1xi32> to vector<16x128xi32>
    %11 = vector.broadcast %3 : vector<1x128xi32> to vector<16x128xi32>
    %12 = arith.cmpi eq, %10, %11 : vector<16x128xi32>
    %13 = arith.extui %12 : vector<16x128xi1> to vector<16x128xi32>
    %14 = arith.sitofp %13 : vector<16x128xi32> to vector<16x128xf32>
    %15 = arith.truncf %14 : vector<16x128xf32> to vector<16x128xbf16>
    %c0_i32 = arith.constant 0 : i32
    %16 = vector.broadcast %c0_i32 : i32 to vector<16x128xi32>
    %17 = vector.extract_strided_slice %0 {offsets = [0, 2], sizes = [16, 1], strides = [1, 1]} : vector<16x10xi32> to vector<16x1xi32>
    %18 = vector.broadcast %17 : vector<16x1xi32> to vector<16x128xi32>
    %19 = vector.broadcast %3 : vector<1x128xi32> to vector<16x128xi32>
    %20 = arith.cmpi eq, %18, %19 : vector<16x128xi32>
    %21 = arith.extui %20 : vector<16x128xi1> to vector<16x128xi32>
    %22 = arith.addi %16, %21 : vector<16x128xi32>
    %23 = vector.extract_strided_slice %0 {offsets = [0, 3], sizes = [16, 1], strides = [1, 1]} : vector<16x10xi32> to vector<16x1xi32>
    %24 = vector.broadcast %23 : vector<16x1xi32> to vector<16x128xi32>
    %25 = vector.broadcast %3 : vector<1x128xi32> to vector<16x128xi32>
    %26 = arith.cmpi eq, %24, %25 : vector<16x128xi32>
    %27 = arith.extui %26 : vector<16x128xi1> to vector<16x128xi32>
    %28 = arith.addi %22, %27 : vector<16x128xi32>
    %29 = vector.extract_strided_slice %0 {offsets = [0, 4], sizes = [16, 1], strides = [1, 1]} : vector<16x10xi32> to vector<16x1xi32>
    %30 = vector.broadcast %29 : vector<16x1xi32> to vector<16x128xi32>
    %31 = vector.broadcast %3 : vector<1x128xi32> to vector<16x128xi32>
    %32 = arith.cmpi eq, %30, %31 : vector<16x128xi32>
    %33 = arith.extui %32 : vector<16x128xi1> to vector<16x128xi32>
    %34 = arith.addi %28, %33 : vector<16x128xi32>
    %35 = vector.extract_strided_slice %0 {offsets = [0, 5], sizes = [16, 1], strides = [1, 1]} : vector<16x10xi32> to vector<16x1xi32>
    %36 = vector.broadcast %35 : vector<16x1xi32> to vector<16x128xi32>
    %37 = vector.broadcast %3 : vector<1x128xi32> to vector<16x128xi32>
    %38 = arith.cmpi eq, %36, %37 : vector<16x128xi32>
    %39 = arith.extui %38 : vector<16x128xi1> to vector<16x128xi32>
    %40 = arith.addi %34, %39 : vector<16x128xi32>
    %41 = vector.extract_strided_slice %0 {offsets = [0, 6], sizes = [16, 1], strides = [1, 1]} : vector<16x10xi32> to vector<16x1xi32>
    %42 = vector.broadcast %41 : vector<16x1xi32> to vector<16x128xi32>
    %43 = vector.broadcast %3 : vector<1x128xi32> to vector<16x128xi32>
    %44 = arith.cmpi eq, %42, %43 : vector<16x128xi32>
    %45 = arith.extui %44 : vector<16x128xi1> to vector<16x128xi32>
    %46 = arith.addi %40, %45 : vector<16x128xi32>
    %47 = vector.extract_strided_slice %0 {offsets = [0, 7], sizes = [16, 1], strides = [1, 1]} : vector<16x10xi32> to vector<16x1xi32>
    %48 = vector.broadcast %47 : vector<16x1xi32> to vector<16x128xi32>
    %49 = vector.broadcast %3 : vector<1x128xi32> to vector<16x128xi32>
    %50 = arith.cmpi eq, %48, %49 : vector<16x128xi32>
    %51 = arith.extui %50 : vector<16x128xi1> to vector<16x128xi32>
    %52 = arith.addi %46, %51 : vector<16x128xi32>
    %53 = vector.extract_strided_slice %0 {offsets = [0, 8], sizes = [16, 1], strides = [1, 1]} : vector<16x10xi32> to vector<16x1xi32>
    %54 = vector.broadcast %53 : vector<16x1xi32> to vector<16x128xi32>
    %55 = vector.broadcast %3 : vector<1x128xi32> to vector<16x128xi32>
    %56 = arith.cmpi eq, %54, %55 : vector<16x128xi32>
    %57 = arith.extui %56 : vector<16x128xi1> to vector<16x128xi32>
    %58 = arith.addi %52, %57 : vector<16x128xi32>
    %59 = vector.extract_strided_slice %0 {offsets = [0, 9], sizes = [16, 1], strides = [1, 1]} : vector<16x10xi32> to vector<16x1xi32>
    %60 = vector.broadcast %59 : vector<16x1xi32> to vector<16x128xi32>
    %61 = vector.broadcast %3 : vector<1x128xi32> to vector<16x128xi32>
    %62 = arith.cmpi eq, %60, %61 : vector<16x128xi32>
    %63 = arith.extui %62 : vector<16x128xi1> to vector<16x128xi32>
    %64 = arith.addi %58, %63 : vector<16x128xi32>
    %65 = arith.sitofp %64 : vector<16x128xi32> to vector<16x128xbf16>
    %c0_1 = arith.constant 0 : index
    %c0_2 = arith.constant 0 : index
    %66 = vector.load %arg2[%c0_1, %c0_2] : memref<128x32xbf16, #tpu.memory_space<vmem>>, vector<128x32xbf16>
    %c0_3 = arith.constant 0 : index
    %c0_4 = arith.constant 0 : index
    %67 = vector.load %arg3[%c0_3, %c0_4] : memref<128x32xbf16, #tpu.memory_space<vmem>>, vector<128x32xbf16>
    %cst = arith.constant dense<0.000000e+00> : vector<16x32xf32>
    %68 = tpu.matmul %9, %66, %cst {dimension_numbers = #tpu.dot_dimension_numbers<[1], [0], [0], [1], [0, 0, 1, 1], [], []>} : vector<16x128xbf16>, vector<128x32xbf16>, vector<16x32xf32> -> vector<16x32xf32>
    %69 = tpu.concatenate %15, %65 in 0 : vector<16x128xbf16>, vector<16x128xbf16> -> vector<32x128xbf16>
    %cst_5 = arith.constant dense<0.000000e+00> : vector<32x32xf32>
    %70 = tpu.matmul %69, %67, %cst_5 {dimension_numbers = #tpu.dot_dimension_numbers<[1], [0], [0], [1], [0, 0, 1, 1], [], []>} : vector<32x128xbf16>, vector<128x32xbf16>, vector<32x32xf32> -> vector<32x32xf32>
    %71 = vector.extract_strided_slice %70 {offsets = [0, 0], sizes = [16, 32], strides = [1, 1]} : vector<32x32xf32> to vector<16x32xf32>
    %72 = vector.extract_strided_slice %70 {offsets = [16, 0], sizes = [16, 32], strides = [1, 1]} : vector<32x32xf32> to vector<16x32xf32>
    %73 = arith.mulf %68, %71 : vector<16x32xf32>
    %cst_6 = arith.constant dense<0.000000e+00> : vector<16xf32>
    %74 = vector.multi_reduction <add>, %73, %cst_6 [1] : vector<16x32xf32> to vector<16xf32>
    %75 = vector.shape_cast %74 : vector<16xf32> to vector<16x1xf32>
    %76 = arith.mulf %72, %68 : vector<16x32xf32>
    %cst_7 = arith.constant dense<0.000000e+00> : vector<16xf32>
    %77 = vector.multi_reduction <add>, %76, %cst_7 [1] : vector<16x32xf32> to vector<16xf32>
    %78 = vector.shape_cast %77 : vector<16xf32> to vector<16x1xf32>
    %cst_8 = arith.constant 0.000000e+00 : f32
    %79 = vector.broadcast %cst_8 : f32 to vector<16x1xf32>
    %80 = arith.minimumf %75, %79 : vector<16x1xf32>
    %81 = math.absf %75 : vector<16x1xf32>
    %cst_9 = arith.constant 0.000000e+00 : f32
    %82 = vector.broadcast %cst_9 : f32 to vector<16x1xf32>
    %83 = arith.subf %82, %81 : vector<16x1xf32>
    %84 = math.exp %83 : vector<16x1xf32>
    %85 = math.log1p %84 : vector<16x1xf32>
    %86 = arith.subf %80, %85 : vector<16x1xf32>
    %cst_10 = arith.constant 0.000000e+00 : f32
    %87 = vector.broadcast %cst_10 : f32 to vector<16x1xf32>
    %88 = arith.subf %87, %78 : vector<16x1xf32>
    %cst_11 = arith.constant 0.000000e+00 : f32
    %89 = vector.broadcast %cst_11 : f32 to vector<16x1xf32>
    %90 = arith.minimumf %88, %89 : vector<16x1xf32>
    %91 = math.absf %88 : vector<16x1xf32>
    %cst_12 = arith.constant 0.000000e+00 : f32
    %92 = vector.broadcast %cst_12 : f32 to vector<16x1xf32>
    %93 = arith.subf %92, %91 : vector<16x1xf32>
    %94 = math.exp %93 : vector<16x1xf32>
    %95 = math.log1p %94 : vector<16x1xf32>
    %96 = arith.subf %90, %95 : vector<16x1xf32>
    %97 = arith.addf %86, %96 : vector<16x1xf32>
    %cst_13 = arith.constant dense<0.000000e+00> : vector<1xf32>
    %98 = vector.multi_reduction <add>, %97, %cst_13 [0] : vector<16x1xf32> to vector<1xf32>
    %99 = vector.shape_cast %98 : vector<1xf32> to vector<1x1xf32>
    %100 = vector.shape_cast %99 : vector<1x1xf32> to vector<1x1x1xf32>
    %101 = vector.shape_cast %100 : vector<1x1x1xf32> to vector<1x1x1xf32>
    %102 = vector.broadcast %101 : vector<1x1x1xf32> to vector<1x8x128xf32>
    %c0_14 = arith.constant 0 : index
    %c0_15 = arith.constant 0 : index
    %c0_16 = arith.constant 0 : index
    %103 = vector.load %arg4[%c0_14, %c0_15, %c0_16] : memref<1x8x128xf32, #tpu.memory_space<vmem>>, vector<1x8x128xf32>
    tpu.vector_store %arg4[%c0_14, %c0_15, %c0_16], %102 {strides = array<i32>} : memref<1x8x128xf32, #tpu.memory_space<vmem>>, vector<1x8x128xf32>,
    return
  }
  func.func @transform_0(%arg0: i32) -> (i32, i32) {
    %c0_i32 = arith.constant 0 : i32
    %c0_i32_0 = arith.constant 0 : i32
    return %arg0, %c0_i32 : i32, i32
  }
  func.func @transform_1(%arg0: i32) -> (i32, i32) {
    %c0_i32 = arith.constant 0 : i32
    %c0_i32_0 = arith.constant 0 : i32
    %c0_i32_1 = arith.constant 0 : i32
    return %c0_i32, %c0_i32_0 : i32, i32
  }
  func.func @transform_2(%arg0: i32) -> (i32, i32) {
    %c0_i32 = arith.constant 0 : i32
    %c0_i32_0 = arith.constant 0 : i32
    %c0_i32_1 = arith.constant 0 : i32
    return %c0_i32, %c0_i32_0 : i32, i32
  }
  func.func @transform_3(%arg0: i32) -> (i32, i32, i32) {
    %c0_i32 = arith.constant 0 : i32
    %c0_i32_0 = arith.constant 0 : i32
    %c0_i32_1 = arith.constant 0 : i32
    return %arg0, %c0_i32, %c0_i32_0 : i32, i32, i32
  }
}

module attributes {stable_mosaic.version = 11 : i64} {
  func.func @skipgram_loss_kernel(%arg0: i32, %arg1: memref<16x10xi32, #tpu.memory_space<vmem>>, %arg2: memref<128x32xbf16, #tpu.memory_space<vmem>>, %arg3: memref<128x32xbf16, #tpu.memory_space<vmem>>, %arg4: memref<1x8x128xf32, #tpu.memory_space<vmem>>) attributes {dimension_semantics = [#tpu.dimension_semantics<parallel>], iteration_bounds = array<i64: 1>, scalar_prefetch = 0 : i64, scratch_operands = 0 : i64, tpu.core_type = #tpu.core_type<tc>, window_params = [{transform_indices = @transform_0, window_bounds = array<i64: 16, 10>}, {pipeline_mode = #tpu.pipeline_mode<synchronous>, transform_indices = @transform_1, window_bounds = array<i64: 128, 32>}, {pipeline_mode = #tpu.pipeline_mode<synchronous>, transform_indices = @transform_2, window_bounds = array<i64: 128, 32>}, {transform_indices = @transform_3, window_bounds = array<i64: 1, 8, 128>}]} {
    %c0 = arith.constant 0 : index
    %c0_0 = arith.constant 0 : index
    %0 = vector.load %arg1[%c0, %c0_0] : memref<16x10xi32, #tpu.memory_space<vmem>>, vector<16x10xi32>
    %1 = vector.extract_strided_slice %0 {offsets = [0, 0], sizes = [16, 1], strides = [1, 1]} : vector<16x10xi32> to vector<16x1xi32>
    %2 = vector.extract_strided_slice %0 {offsets = [0, 1], sizes = [16, 1], strides = [1, 1]} : vector<16x10xi32> to vector<16x1xi32>
    %3 = tpu.iota {dimensions = array<i32: 1>} : vector<1x128xi32>
    %4 = vector.broadcast %1 : vector<16x1xi32> to vector<16x128xi32>
    %5 = vector.broadcast %3 : vector<1x128xi32> to vector<16x128xi32>
    %6 = arith.cmpi eq, %4, %5 : vector<16x128xi32>
    %7 = arith.extui %6 : vector<16x128xi1> to vector<16x128xi32>
    %8 = arith.sitofp %7 : vector<16x128xi32> to vector<16x128xf32>
    %9 = arith.truncf %8 : vector<16x128xf32> to vector<16x128xbf16>
    %10 = vector.broadcast %2 : vector<16x1xi32> to vector<16x128xi32>
    %11 = vector.broadcast %3 : vector<1x128xi32> to vector<16x128xi32>
    %12 = arith.cmpi eq, %10, %11 : vector<16x128xi32>
    %13 = arith.extui %12 : vector<16x128xi1> to vector<16x128xi32>
    %14 = arith.sitofp %13 : vector<16x128xi32> to vector<16x128xf32>
    %15 = arith.truncf %14 : vector<16x128xf32> to vector<16x128xbf16>
    %c0_i32 = arith.constant 0 : i32
    %16 = vector.broadcast %c0_i32 : i32 to vector<16x128xi32>
    %17 = vector.extract_strided_slice %0 {offsets = [0, 2], sizes = [16, 1], strides = [1, 1]} : vector<16x10xi32> to vector<16x1xi32>
    %18 = vector.broadcast %17 : vector<16x1xi32> to vector<16x128xi32>
    %19 = vector.broadcast %3 : vector<1x128xi32> to vector<16x128xi32>
    %20 = arith.cmpi eq, %18, %19 : vector<16x128xi32>
    %21 = arith.extui %20 : vector<16x128xi1> to vector<16x128xi32>
    %22 = arith.addi %16, %21 : vector<16x128xi32>
    %23 = vector.extract_strided_slice %0 {offsets = [0, 3], sizes = [16, 1], strides = [1, 1]} : vector<16x10xi32> to vector<16x1xi32>
    %24 = vector.broadcast %23 : vector<16x1xi32> to vector<16x128xi32>
    %25 = vector.broadcast %3 : vector<1x128xi32> to vector<16x128xi32>
    %26 = arith.cmpi eq, %24, %25 : vector<16x128xi32>
    %27 = arith.extui %26 : vector<16x128xi1> to vector<16x128xi32>
    %28 = arith.addi %22, %27 : vector<16x128xi32>
    %29 = vector.extract_strided_slice %0 {offsets = [0, 4], sizes = [16, 1], strides = [1, 1]} : vector<16x10xi32> to vector<16x1xi32>
    %30 = vector.broadcast %29 : vector<16x1xi32> to vector<16x128xi32>
    %31 = vector.broadcast %3 : vector<1x128xi32> to vector<16x128xi32>
    %32 = arith.cmpi eq, %30, %31 : vector<16x128xi32>
    %33 = arith.extui %32 : vector<16x128xi1> to vector<16x128xi32>
    %34 = arith.addi %28, %33 : vector<16x128xi32>
    %35 = vector.extract_strided_slice %0 {offsets = [0, 5], sizes = [16, 1], strides = [1, 1]} : vector<16x10xi32> to vector<16x1xi32>
    %36 = vector.broadcast %35 : vector<16x1xi32> to vector<16x128xi32>
    %37 = vector.broadcast %3 : vector<1x128xi32> to vector<16x128xi32>
    %38 = arith.cmpi eq, %36, %37 : vector<16x128xi32>
    %39 = arith.extui %38 : vector<16x128xi1> to vector<16x128xi32>
    %40 = arith.addi %34, %39 : vector<16x128xi32>
    %41 = vector.extract_strided_slice %0 {offsets = [0, 6], sizes = [16, 1], strides = [1, 1]} : vector<16x10xi32> to vector<16x1xi32>
    %42 = vector.broadcast %41 : vector<16x1xi32> to vector<16x128xi32>
    %43 = vector.broadcast %3 : vector<1x128xi32> to vector<16x128xi32>
    %44 = arith.cmpi eq, %42, %43 : vector<16x128xi32>
    %45 = arith.extui %44 : vector<16x128xi1> to vector<16x128xi32>
    %46 = arith.addi %40, %45 : vector<16x128xi32>
    %47 = vector.extract_strided_slice %0 {offsets = [0, 7], sizes = [16, 1], strides = [1, 1]} : vector<16x10xi32> to vector<16x1xi32>
    %48 = vector.broadcast %47 : vector<16x1xi32> to vector<16x128xi32>
    %49 = vector.broadcast %3 : vector<1x128xi32> to vector<16x128xi32>
    %50 = arith.cmpi eq, %48, %49 : vector<16x128xi32>
    %51 = arith.extui %50 : vector<16x128xi1> to vector<16x128xi32>
    %52 = arith.addi %46, %51 : vector<16x128xi32>
    %53 = vector.extract_strided_slice %0 {offsets = [0, 8], sizes = [16, 1], strides = [1, 1]} : vector<16x10xi32> to vector<16x1xi32>
    %54 = vector.broadcast %53 : vector<16x1xi32> to vector<16x128xi32>
    %55 = vector.broadcast %3 : vector<1x128xi32> to vector<16x128xi32>
    %56 = arith.cmpi eq, %54, %55 : vector<16x128xi32>
    %57 = arith.extui %56 : vector<16x128xi1> to vector<16x128xi32>
    %58 = arith.addi %52, %57 : vector<16x128xi32>
    %59 = vector.extract_strided_slice %0 {offsets = [0, 9], sizes = [16, 1], strides = [1, 1]} : vector<16x10xi32> to vector<16x1xi32>
    %60 = vector.broadcast %59 : vector<16x1xi32> to vector<16x128xi32>
    %61 = vector.broadcast %3 : vector<1x128xi32> to vector<16x128xi32>
    %62 = arith.cmpi eq, %60, %61 : vector<16x128xi32>
    %63 = arith.extui %62 : vector<16x128xi1> to vector<16x128xi32>
    %64 = arith.addi %58, %63 : vector<16x128xi32>
    %65 = arith.sitofp %64 : vector<16x128xi32> to vector<16x128xbf16>
    %c0_1 = arith.constant 0 : index
    %c0_2 = arith.constant 0 : index
    %66 = vector.load %arg2[%c0_1, %c0_2] : memref<128x32xbf16, #tpu.memory_space<vmem>>, vector<128x32xbf16>
    %c0_3 = arith.constant 0 : index
    %c0_4 = arith.constant 0 : index
    %67 = vector.load %arg3[%c0_3, %c0_4] : memref<128x32xbf16, #tpu.memory_space<vmem>>, vector<128x32xbf16>
    %cst = arith.constant dense<0.000000e+00> : vector<16x32xf32>
    %68 = tpu.matmul %9, %66, %cst {dimension_numbers = #tpu.dot_dimension_numbers<[1], [0], [0], [1], [0, 0, 1, 1], [], []>} : vector<16x128xbf16>, vector<128x32xbf16>, vector<16x32xf32> -> vector<16x32xf32>
    %69 = tpu.concatenate %15, %65 in 0 : vector<16x128xbf16>, vector<16x128xbf16> -> vector<32x128xbf16>
    %cst_5 = arith.constant dense<0.000000e+00> : vector<32x32xf32>
    %70 = tpu.matmul %69, %67, %cst_5 {dimension_numbers = #tpu.dot_dimension_numbers<[1], [0], [0], [1], [0, 0, 1, 1], [], []>} : vector<32x128xbf16>, vector<128x32xbf16>, vector<32x32xf32> -> vector<32x32xf32>
    %71 = vector.extract_strided_slice %70 {offsets = [0, 0], sizes = [16, 32], strides = [1, 1]} : vector<32x32xf32> to vector<16x32xf32>
    %72 = vector.extract_strided_slice %70 {offsets = [16, 0], sizes = [16, 32], strides = [1, 1]} : vector<32x32xf32> to vector<16x32xf32>
    %73 = arith.mulf %68, %71 : vector<16x32xf32>
    %cst_6 = arith.constant dense<0.000000e+00> : vector<16xf32>
    %74 = vector.multi_reduction <add>, %73, %cst_6 [1] : vector<16x32xf32> to vector<16xf32>
    %75 = vector.shape_cast %74 : vector<16xf32> to vector<16x1xf32>
    %76 = arith.mulf %72, %68 : vector<16x32xf32>
    %cst_7 = arith.constant dense<0.000000e+00> : vector<16xf32>
    %77 = vector.multi_reduction <add>, %76, %cst_7 [1] : vector<16x32xf32> to vector<16xf32>
    %78 = vector.shape_cast %77 : vector<16xf32> to vector<16x1xf32>
    %cst_8 = arith.constant 0.000000e+00 : f32
    %79 = vector.broadcast %cst_8 : f32 to vector<16x1xf32>
    %80 = arith.minimumf %75, %79 : vector<16x1xf32>
    %81 = math.absf %75 : vector<16x1xf32>
    %cst_9 = arith.constant 0.000000e+00 : f32
    %82 = vector.broadcast %cst_9 : f32 to vector<16x1xf32>
    %83 = arith.subf %82, %81 : vector<16x1xf32>
    %84 = math.exp %83 : vector<16x1xf32>
    %85 = math.log1p %84 : vector<16x1xf32>
    %86 = arith.subf %80, %85 : vector<16x1xf32>
    %cst_10 = arith.constant 0.000000e+00 : f32
    %87 = vector.broadcast %cst_10 : f32 to vector<16x1xf32>
    %88 = arith.subf %87, %78 : vector<16x1xf32>
    %cst_11 = arith.constant 0.000000e+00 : f32
    %89 = vector.broadcast %cst_11 : f32 to vector<16x1xf32>
    %90 = arith.minimumf %88, %89 : vector<16x1xf32>
    %91 = math.absf %88 : vector<16x1xf32>
    %cst_12 = arith.constant 0.000000e+00 : f32
    %92 = vector.broadcast %cst_12 : f32 to vector<16x1xf32>
    %93 = arith.subf %92, %91 : vector<16x1xf32>
    %94 = math.exp %93 : vector<16x1xf32>
    %95 = math.log1p %94 : vector<16x1xf32>
    %96 = arith.subf %90, %95 : vector<16x1xf32>
    %97 = arith.addf %86, %96 : vector<16x1xf32>
    %cst_13 = arith.constant dense<0.000000e+00> : vector<1xf32>
    %98 = vector.multi_reduction <add>, %97, %cst_13 [0] : vector<16x1xf32> to vector<1xf32>
    %99 = vector.shape_cast %98 : vector<1xf32> to vector<1x1xf32>
    %100 = vector.shape_cast %99 : vector<1x1xf32> to vector<1x1x1xf32>
    %101 = vector.shape_cast %100 : vector<1x1x1xf32> to vector<1x1x1xf32>
    %102 = vector.broadcast %101 : vector<1x1x1xf32> to vector<1x8x128xf32>
    %c0_14 = arith.constant 0 : index
    %c0_15 = arith.constant 0 : index
    %c0_16 = arith.constant 0 : index
    %103 = vector.load %arg4[%c0_14, %c0_15, %c0_16] : memref<1x8x128xf32, #tpu.memory_space<vmem>>, vector<1x8x128xf32>
    tpu.vector_store %arg4[%c0_14, %c0_15, %c0_16], %102 {strides = array<i32>} : memref<1x8x128xf32, #tpu.memory_space<vmem>>, vector<1x8x128xf32>,
    return
  }
  func.func @transform_0(%arg0: i32) -> (i32, i32) {
    %c0_i32 = arith.constant 0 : i32
    %c0_i32_0 = arith.constant 0 : i32
    return %arg0, %c0_i32 : i32, i32
  }
  func.func @transform_1(%arg0: i32) -> (i32, i32) {
    %c0_i32 = arith.constant 0 : i32
    %c0_i32_0 = arith.constant 0 : i32
    %c0_i32_1 = arith.constant 0 : i32
    return %c0_i32, %c0_i32_0 : i32, i32
  }
  func.func @transform_2(%arg0: i32) -> (i32, i32) {
    %c0_i32 = arith.constant 0 : i32
    %c0_i32_0 = arith.constant 0 : i32
    %c0_i32_1 = arith.constant 0 : i32
    return %c0_i32, %c0_i32_0 : i32, i32
  }
  func.func @transform_3(%arg0: i32) -> (i32, i32, i32) {
    %c0_i32 = arith.constant 0 : i32
    %c0_i32_0 = arith.constant 0 : i32
    %c0_i32_1 = arith.constant 0 : i32
    return %arg0, %c0_i32, %c0_i32_0 : i32, i32, i32
  }
}

</mosaic_0001>

<bundles_post_ra>
// kernel: tpu_custom_call.1
= control target key start
LH: loop header
LB: loop body
LE: loop exit
PB: predicated region body
PF: predicated region fallthrough
CT: control target
= control target key end

     0   :  { %v634_v1 = vmov 3   ;;  %v635_v2 = vmov 2   ;;  %v636_v4 = vmov 4   ;;  %s824_s0 = inlined_call_operand.vmem [shape: s32[16,10], index: 0, kind: input, shape index: {}]   ;;  %s825_s1 = inlined_call_operand.vmem [shape: bf16[128,32], index: 1, kind: input, shape index: {}]   ;;  %s826_s2 = inlined_call_operand.vmem [shape: bf16[128,32], index: 2, kind: input, shape index: {}]   ;;  %s827_s3 = inlined_call_operand.hbm [shape: f32[1,8,128], index: 3, kind: output, shape index: {}]  }
   0x1   :  { %v671_v0 = vld [vmem:[%s824_s0] sm:$0xff]  ;;  %562 = vset.pattern.permute.xlu1 %v634_v1  ;;  %561 = vset.pattern.permute.xlu0 %v635_v2  ;;  %v678_v3 = vld [vmem:[%s824_s0 + $0x8] sm:$0xff] }
   0x2   :  { %57 = vperm.xlu1 %562, %v671_v0   ;;  %47 = vperm.xlu0 %561, %v671_v0  }
   0x6   :  { %60 = vperm.xlu1 %562, %v678_v3   ;;  %50 = vperm.xlu0 %561, %v678_v3  }
   0xa   :  { %564 = vset.pattern.permute.xlu1 %v636_v4  ;;  %563 = vset.pattern.permute.xlu0 %v636_v4 }
   0xb   :  { %72 = vperm.xlu1 %564, %v678_v3   ;;  %69 = vperm.xlu0 %563, %v671_v0  }
   0xc   :  { %8 = vsyncpa [#allocation3], 0  ;;  %v637_v5 = vmov 5   ;;  %v578_v6 = vld [vmem:[%s826_s2] sm:$0xff]   ;;  %v638_v7 = vmov 6   ;;  %v639_v8 = vmov 7   ;;  %v18_v35 = vlaneseq }
   0xd   :  { %527 = vmatprep.subr.bf16.mxu1 %v578_v6  ;;  %v579_v9 = vld [vmem:[%s826_s2 + $0x8] sm:$0xff]   ;;  %v580_v10 = vld [vmem:[%s825_s1] sm:$0xff]   ;;  %v640_v11 = vmov 0.0   ;;  %v641_v12 = vmov 8   ;;  %v581_v13 = vld [vmem:[%s826_s2 + $0x10] sm:$0xff]   ;;  %v642_v15 = vmov 1  }
   0xe   :  { %528 = vmatpush3.bf16.msra.mxu1 %v578_v6  ;;  %507 = vmatprep.subr.bf16.mxu0 %v640_v11  ;;  %v582_v14 = vld [vmem:[%s825_s1 + $0x8] sm:$0xff]   ;;  %v583_v16 = vld [vmem:[%s826_s2 + $0x18] sm:$0xff]   ;;  %v584_v17 = vld [vmem:[%s825_s1 + $0x10] sm:$0xff]   ;;  %v643_v19 = vmov 0   ;;  %v644_v22 = vmov 9   ;;  %vm645_vm0 = vmmov 0  }
   0xf   :  { %565 = vset.pattern.permute.xlu1 %v637_v5  ;;  %566 = vset.pattern.permute.xlu0 %v637_v5  ;;  %v585_v18 = vld [vmem:[%s826_s2 + $0x20] sm:$0xff]   ;;  %v586_v20 = vld [vmem:[%s825_s1 + $0x18] sm:$0xff]   ;;  %v587_v21 = vld [vmem:[%s826_s2 + $0x28] sm:$0xff]   ;;  %v757_v36 = vand.u32 127, %v18_v35 }
  0x10   :  { %81 = vperm.xlu1 %565, %v671_v0   ;;  %84 = vperm.xlu0 %566, %v678_v3   ;;  %v588_v23 = vld [vmem:[%s825_s1 + $0x20] sm:$0xff]   ;;  %v589_v24 = vld [vmem:[%s826_s2 + $0x30] sm:$0xff]   ;;  %v590_v25 = vld [vmem:[%s825_s1 + $0x28] sm:$0xff]  }
  0x11   :  { %529 = vmatprep.subr.bf16.mxu1 %v579_v9  ;;  %508 = vmatpush3.bf16.msra.mxu0 %v580_v10  ;;  %v591_v26 = vld [vmem:[%s826_s2 + $0x38] sm:$0xff]   ;;  %v592_v27 = vld [vmem:[%s825_s1 + $0x30] sm:$0xff]  }
  0x12   :  { %530 = vmatpush3.bf16.msra.mxu1 %v579_v9  ;;  %509 = vmatprep.subr.bf16.mxu0 %v640_v11  ;;  %v593_v28 = vld [vmem:[%s825_s1 + $0x38] sm:$0xff]   ;;  %s647_s1 = smov [#allocation2]  }
  0x13   :  { %531 = vmatprep.subr.bf16.mxu1 %v581_v13  ;;  %523 = vmatprep.mubr.msk.bf16.mxu0 %vm645_vm0, %v640_v11  ;;  %s456_s2 = sshll.u32 %s647_s1, 4  ;;  %s457_s2 = int_to_ptr.vmem [resolvable:$true] %s456_s2 }
  0x14   :  { %567 = vset.pattern.permute.xlu1 %v638_v7  ;;  %568 = vset.pattern.permute.xlu0 %v639_v8  ;;  %s610_s19 = scalar_lea.vmem %s457_s2, 128  ;;  %p615_p1 = scmp.lt.s32.totalorder %s457_s2, %s457_s2 }
  0x15   :  { %93 = vperm.xlu1 %567, %v671_v0   ;;  %105 = vperm.xlu0 %568, %v671_v0   ;;  %p611_p0 = scmp.ne.s32.totalorder %s457_s2, %s610_s19  ;;  %p616_p2 = scmp.lt.s32.totalorder %s610_s19, %s610_s19 }
  0x16   :  { %510 = vmatpush3.bf16.msra.mxu0 %v582_v14  ;;  %532 = vmatpush3.bf16.msra.mxu1 %v581_v13 }
  0x17   :  { %511 = vmatprep.subr.bf16.mxu0 %v640_v11  ;;  %533 = vmatprep.subr.bf16.mxu1 %v583_v16  ;;  %p617_p3 = por %p616_p2, %p615_p1 }
  0x19   :  { %96 = vperm.xlu1 %567, %v678_v3   ;;  %571 = vset.pattern.permute.xlu0 %v641_v12  ;;  %p618_p4 = pnand %p617_p3, %p611_p0 }
  0x1a   :  { %120 = vperm.xlu0 %571, %v678_v3   ;;  %512 = vmatpush3.bf16.msra.mxu0 %v584_v17 }
  0x1b   :  { %534 = vmatpush3.bf16.msra.mxu1 %v583_v16  ;;  %513 = vmatprep.subr.bf16.mxu0 %v640_v11 }
  0x1c   :  { %535 = vmatprep.subr.bf16.mxu1 %v585_v18 }
  0x1d   :  { %569 = vset.pattern.permute.xlu1 %v639_v8 }
  0x1e   :  { %108 = vperm.xlu1 %569, %v678_v3   ;;  %573 = vset.pattern.permute.xlu0 %v642_v15 }
  0x1f   :  { %34 = vperm.xlu0 %573, %v671_v0   ;;  %514 = vmatpush3.bf16.msra.mxu0 %v586_v20  ;;  %v646_v20 = vmov 1.0|1.0  }
  0x20   :  { %536 = vmatpush3.bf16.msra.mxu1 %v585_v18  ;;  %515 = vmatprep.subr.bf16.mxu0 %v640_v11 }
  0x21   :  { %537 = vmatprep.subr.bf16.mxu1 %v587_v21 }
  0x22   :  { %570 = vset.pattern.permute.xlu1 %v641_v12 }
  0x23   :  { %117 = vperm.xlu1 %570, %v671_v0   ;;  %576 = vset.pattern.permute.xlu0 %v643_v19 }
  0x24   :  { %24 = vperm.xlu0 %576, %v678_v3   ;;  %516 = vmatpush3.bf16.msra.mxu0 %v588_v23 }
  0x25   :  { %538 = vmatpush3.bf16.msra.mxu1 %v587_v21  ;;  %517 = vmatprep.subr.bf16.mxu0 %v640_v11 }
  0x26   :  { %539 = vmatprep.subr.bf16.mxu1 %v589_v24 }
  0x27   :  { %572 = vset.pattern.permute.xlu1 %v644_v22 }
  0x28   :  { %129 = vperm.xlu1 %572, %v671_v0   ;;  %577 = vset.pattern.permute.xlu0 %v644_v22 }
  0x29   :  { %518 = vmatpush3.bf16.msra.mxu0 %v590_v25  ;;  %540 = vmatpush3.bf16.msra.mxu1 %v589_v24 }
  0x2a   :  { %519 = vmatprep.subr.bf16.mxu0 %v640_v11  ;;  %541 = vmatprep.subr.bf16.mxu1 %v591_v26 }
  0x2c   :  { %132 = vperm.xlu1 %572, %v678_v3  }
  0x2d   :  { %520 = vmatpush3.bf16.msra.mxu0 %v592_v27  ;;  %542 = vmatpush3.bf16.msra.mxu1 %v591_v26 }
  0x2e   :  { %521 = vmatprep.subr.bf16.mxu0 %v640_v11 }
  0x30   :  { %574 = vset.pattern.permute.xlu1 %v642_v15 }
  0x31   :  { %37 = vperm.xlu1 %574, %v678_v3   ;;  %522 = vmatpush3.bf16.msra.mxu0 %v593_v28 }
  0x35   :  { %575 = vset.pattern.permute.xlu1 %v643_v19 }
  0x36   :  { %21 = vperm.xlu1 %575, %v671_v0  }
  0x81   :  { %v58_v29 = vpop.permute.xlu1 %57  ;;  %v48_v31 = vpop.permute.xlu0 %47 }
  0x82   :  { %vm62_vm1 = vcmp.eq.s32.totalorder %v58_v29, %v757_v36  ;;  %vm52_vm2 = vcmp.eq.s32.totalorder %v48_v31, %v757_v36 }
  0x83   :  { %v64_v40 = vsel %vm62_vm1, 1, %v643_v19  ;;  %v54_v41 = vsel %vm52_vm2, 1, %v643_v19 }
  0x84   :  { %v66_v47 = vadd.s32 %v64_v40, %v54_v41 }
  0x85   :  { %v61_v30 = vpop.permute.xlu1 %60  ;;  %v51_v33 = vpop.permute.xlu0 %50 }
  0x86   :  { %vm63_vm3 = vcmp.eq.s32.totalorder %v61_v30, %v757_v36  ;;  %vm53_vm4 = vcmp.eq.s32.totalorder %v51_v33, %v757_v36 }
  0x87   :  { %v65_v43 = vsel %vm63_vm3, 1, %v643_v19  ;;  %v55_v44 = vsel %vm53_vm4, 1, %v643_v19 }
  0x88   :  { %v67_v51 = vadd.s32 %v65_v43, %v55_v44 }
  0x8a   :  { %v73_v32 = vpop.permute.xlu1 %72  ;;  %v70_v38 = vpop.permute.xlu0 %69 }
  0x8b   :  { %vm74_vm5 = vcmp.eq.s32.totalorder %v70_v38, %v757_v36  ;;  %vm75_vm6 = vcmp.eq.s32.totalorder %v73_v32, %v757_v36 }
  0x8c   :  { %v76_v45 = vsel %vm74_vm5, 1, %v643_v19  ;;  %v77_v48 = vsel %vm75_vm6, 1, %v643_v19 }
  0x8d   :  { %v78_v52 = vadd.s32 %v76_v45, %v66_v47  ;;  %v79_v55 = vadd.s32 %v77_v48, %v67_v51 }
  0x8f   :  { %v82_v34 = vpop.permute.xlu1 %81  ;;  %v85_v42 = vpop.permute.xlu0 %84 }
  0x90   :  { %vm86_vm7 = vcmp.eq.s32.totalorder %v82_v34, %v757_v36  ;;  %vm87_vm8 = vcmp.eq.s32.totalorder %v85_v42, %v757_v36 }
  0x91   :  { %v88_v49 = vsel %vm86_vm7, 1, %v643_v19  ;;  %v89_v53 = vsel %vm87_vm8, 1, %v643_v19  ;;  %vm363_vm7 = vcmask 261120  }
  0x92   :  { %v90_v56 = vadd.s32 %v88_v49, %v78_v52  ;;  %v91_v60 = vadd.s32 %v89_v53, %v79_v55 }
  0x94   :  { %v94_v37 = vpop.permute.xlu1 %93  ;;  %v106_v50 = vpop.permute.xlu0 %105 }
  0x95   :  { %vm98_vm9 = vcmp.eq.s32.totalorder %v94_v37, %v757_v36  ;;  %vm110_vm11 = vcmp.eq.s32.totalorder %v106_v50, %v757_v36 }
  0x96   :  { %v100_v54 = vsel %vm98_vm9, 1, %v643_v19  ;;  %v112_v62 = vsel %vm110_vm11, 1, %v643_v19 }
  0x97   :  { %v102_v61 = vadd.s32 %v100_v54, %v90_v56 }
  0x98   :  { %v97_v39 = vpop.permute.xlu1 %96 }
  0x99   :  { %vm99_vm10 = vcmp.eq.s32.totalorder %v97_v39, %v757_v36  ;;  %v121_v59 = vpop.permute.xlu0 %120  ;;  %v114_v3 = vadd.s32 %v112_v62, %v102_v61 }
  0x9a   :  { %v101_v58 = vsel %vm99_vm10, 1, %v643_v19  ;;  %vm123_vm14 = vcmp.eq.s32.totalorder %v121_v59, %v757_v36 }
  0x9b   :  { %v103_v0 = vadd.s32 %v101_v58, %v91_v60  ;;  %v125_v5 = vsel %vm123_vm14, 1, %v643_v19 }
  0x9d   :  { %v109_v46 = vpop.permute.xlu1 %108 }
  0x9e   :  { %vm111_vm12 = vcmp.eq.s32.totalorder %v109_v46, %v757_v36  ;;  %v35_v9 = vpop.permute.xlu0 %34 }
  0x9f   :  { %v113_v63 = vsel %vm111_vm12, 1, %v643_v19  ;;  %vm39_vm1 = vcmp.eq.s32.totalorder %v35_v9, %v757_v36 }
  0xa0   :  { %v115_v4 = vadd.s32 %v113_v63, %v103_v0 }
  0xa2   :  { %v118_v57 = vpop.permute.xlu1 %117  ;;  %v127_v10 = vadd.s32 %v125_v5, %v115_v4 }
  0xa3   :  { %vm122_vm13 = vcmp.eq.s32.totalorder %v118_v57, %v757_v36  ;;  %v25_v17 = vpop.permute.xlu0 %24 }
  0xa4   :  { %v124_v1 = vsel %vm122_vm13, 1, %v643_v19  ;;  %vm27_vm4 = vcmp.eq.s32.totalorder %v25_v17, %v757_v36 }
  0xa5   :  { %v126_v7 = vadd.s32 %v124_v1, %v114_v3 }
  0xa7   :  { %v130_v2 = vpop.permute.xlu1 %129 }
  0xa8   :  { %vm134_vm15 = vcmp.eq.s32.totalorder %v130_v2, %v757_v36 }
  0xa9   :  { %v136_v6 = vsel %vm134_vm15, 1, %v643_v19 }
  0xaa   :  { %v138_v11 = vadd.s32 %v136_v6, %v126_v7 }
  0xab   :  { %v133_v8 = vpop.permute.xlu1 %132 }
  0xac   :  { %vm135_vm0 = vcmp.eq.s32.totalorder %v133_v8, %v757_v36  ;;  %v140_v14 = vcvt.s32.f32 %v138_v11 }
  0xad   :  { %v137_v12 = vsel %vm135_vm0, 1, %v643_v19 }
  0xae   :  { %v139_v13 = vadd.s32 %v137_v12, %v127_v10 }
  0xb0   :  { %v141_v15 = vcvt.s32.f32 %v139_v13  ;;  %v38_v16 = vpop.permute.xlu1 %37 }
  0xb1   :  { %vm40_vm2 = vcmp.eq.s32.totalorder %v38_v16, %v757_v36 }
  0xb2   :  { %vm486_vm3 = vmpackc.low %vm40_vm2, %vm39_vm1  ;;  %v142_v18 = vpack.c.bf16 %v141_v15, %v140_v14 }
  0xb3   :  { %543 = vmatprep.mubr.msk.bf16.mxu1 %vm486_vm3, %v646_v20 }
  0xb4   :  { %544 = vmatmul.mubr.bf16.vlgmr.msra.gmra.mrb[0].mxu1 %v142_v18 }
  0xb5   :  { %v22_v21 = vpop.permute.xlu1 %21 }
  0xb6   :  { %vm26_vm5 = vcmp.eq.s32.totalorder %v22_v21, %v757_v36 }
  0xb7   :  { %vm476_vm6 = vmpackc.low %vm27_vm4, %vm26_vm5 }
  0xb8   :  { %524 = vmatmul.mubr.msk.bf16.vlgmr.msra.gmra.mrb[0].mxu0 %vm476_vm6, %v646_v20 }
 0x187   :  { %v545_v19 = vpop.f32.mrb[0].mxu1 }
 0x188   :  { %v346_v22 = vpop.f32.mrb[1].mxu1 }
 0x189   :  { %v546_v23 = vpop.f32.mrb[2].mxu1 }
 0x18a   :  { %v349_v24 = vpop.f32.mrb[3].mxu1 }
 0x18b   :  { %v257_v25 = vpop.f32.mrb[0].mxu0 }
 0x18c   :  { %v361_v26 = vmul.f32 %v346_v22, %v257_v25  ;;  %v370_v27 = vmul.f32 %v545_v19, %v257_v25  ;;  %v525_v28 = vpop.f32.mrb[1].mxu0 }
 0x18d   :  { %v260_v29 = vpop.f32.mrb[2].mxu0 }
 0x18e   :  { %v362_v30 = vmul.f32 %v349_v24, %v260_v29  ;;  %v371_v31 = vmul.f32 %v546_v23, %v260_v29  ;;  %v526_v32 = vpop.f32.mrb[3].mxu0  ;;  %v372_v33 = vsel %vm363_vm7, %v370_v27, 0.0  ;;  %v364_v35 = vsel %vm363_vm7, %v361_v26, 0.0 }
 0x18f   :  { %373 = vadd.xlane.f32.xlu1 %v372_v33 }
 0x190   :  { %v375_v34 = vsel %vm363_vm7, %v371_v31, 0.0  ;;  %v367_v36 = vsel %vm363_vm7, %v362_v30, 0.0 }
 0x191   :  { %376 = vadd.xlane.f32.xlu0 %v375_v34 }
 0x193   :  { %365 = vadd.xlane.f32.xlu1 %v364_v35 }
 0x195   :  { %368 = vadd.xlane.f32.xlu0 %v367_v36 }
 0x21c   :  { %v374_v37 = vpop.xlane.xlu1 %373 }
 0x21d   :  { %v408_v38 = vsub.f32 0.0, %v374_v37 }
 0x21e   :  { %v795_v39 = vpop.xlane.xlu0 %376 }
 0x21f   :  { %v412_v40 = vand.u32 2147483647, %v408_v38  ;;  %v409_v41 = vsub.f32 0.0, %v795_v39  ;;  %v410_v13 = vmin.f32 %v408_v38, 0.0 }
 0x220   :  { %v798_v42 = vpop.xlane.xlu1 %365 }
 0x221   :  { %v414_v43 = vsub.f32 0.0, %v412_v40  ;;  %v413_v44 = vand.u32 2147483647, %v409_v41  ;;  %v380_v45 = vand.u32 2147483647, %v798_v42  ;;  %v378_v14 = vmin.f32 %v798_v42, 0.0 }
 0x222   :  { %v801_v46 = vpop.xlane.xlu0 %368  ;;  %v411_v28 = vmin.f32 %v409_v41, 0.0 }
 0x223   :  { %v416_v47 = vmul.f32 1.442695, %v414_v43  ;;  %v415_v48 = vsub.f32 0.0, %v413_v44  ;;  %v381_v49 = vand.u32 2147483647, %v801_v46  ;;  %v382_v50 = vsub.f32 0.0, %v380_v45 }
 0x224   :  { %v379_v30 = vmin.f32 %v801_v46, 0.0 }
 0x225   :  { %594 = vpow2.f32 %v416_v47  ;;  %v418_v51 = vmul.f32 1.442695, %v415_v48  ;;  %v383_v52 = vsub.f32 0.0, %v381_v49  ;;  %v384_v53 = vmul.f32 1.442695, %v382_v50 }
 0x227   :  { %596 = vpow2.f32 %v418_v51  ;;  %v386_v54 = vmul.f32 1.442695, %v383_v52 }
 0x228   :  { %598 = vpow2.f32 %v384_v53 }
 0x229   :  { %600 = vpow2.f32 %v386_v54 }
 0x22f   :  { %v595_v55 = vpop.eup %594 }
 0x230   :  { %v420_v56 = vadd.f32 1.0, %v595_v55  ;;  %v423_v63 = vmul.f32 -0.5, %v595_v55  ;;  %v426_v4 = vand.u32 2147483647, %v595_v55 }
 0x231   :  { %v597_v57 = vpop.eup %596 }
 0x232   :  { %v599_v58 = vpop.eup %598  ;;  %602 = vlog2.f32 %v420_v56  ;;  %v429_v59 = vadd.f32 1.0, %v597_v57  ;;  %v432_v0 = vmul.f32 -0.5, %v597_v57  ;;  %v424_v3 = vadd.f32 1.0, %v423_v63 }
 0x233   :  { %v601_v60 = vpop.eup %600  ;;  %v388_v61 = vadd.f32 1.0, %v599_v58  ;;  %v391_v1 = vmul.f32 -0.5, %v599_v58  ;;  %v435_v7 = vand.u32 2147483647, %v597_v57  ;;  %v394_v9 = vand.u32 2147483647, %v599_v58 }
 0x234   :  { %604 = vlog2.f32 %v429_v59  ;;  %v397_v62 = vadd.f32 1.0, %v601_v60  ;;  %v400_v2 = vmul.f32 -0.5, %v601_v60  ;;  %v433_v5 = vadd.f32 1.0, %v432_v0 }
 0x235   :  { %606 = vlog2.f32 %v388_v61  ;;  %v392_v8 = vadd.f32 1.0, %v391_v1  ;;  %v403_v15 = vand.u32 2147483647, %v601_v60  ;;  %v425_v17 = vmul.f32 %v595_v55, %v424_v3 }
 0x236   :  { %608 = vlog2.f32 %v397_v62  ;;  %v401_v11 = vadd.f32 1.0, %v400_v2  ;;  %vm805_vm8 = vcmp.lt.f32.partialorder %v426_v4, 0.0004427343  ;;  %v434_v21 = vmul.f32 %v597_v57, %v433_v5 }
 0x237   :  { %vm436_vm9 = vcmp.lt.f32.partialorder %v435_v7, 0.0004427343  ;;  %v393_v23 = vmul.f32 %v599_v58, %v392_v8  ;;  %vm395_vm10 = vcmp.lt.f32.partialorder %v394_v9, 0.0004427343  ;;  %vm404_vm11 = vcmp.lt.f32.partialorder %v403_v15, 0.0004427343 }
 0x238   :  { %v402_v27 = vmul.f32 %v601_v60, %v401_v11 }
 0x23c   :  { %v603_v6 = vpop.eup %602 }
 0x23d   :  { %v422_v10 = vmul.f32 0.6931472, %v603_v6 }
 0x23e   :  { %v605_v12 = vpop.eup %604 }
 0x23f   :  { %v607_v16 = vpop.eup %606  ;;  %v431_v20 = vmul.f32 0.6931472, %v605_v12  ;;  %v428_v24 = vsel %vm805_vm8, %v425_v17, %v422_v10 }
 0x240   :  { %v609_v19 = vpop.eup %608  ;;  %v390_v22 = vmul.f32 0.6931472, %v607_v16  ;;  %v438_v33 = vsub.f32 %v410_v13, %v428_v24 }
 0x241   :  { %v437_v25 = vsel %vm436_vm9, %v434_v21, %v431_v20  ;;  %v399_v26 = vmul.f32 0.6931472, %v609_v19 }
 0x242   :  { %v396_v29 = vsel %vm395_vm10, %v393_v23, %v390_v22  ;;  %v439_v34 = vsub.f32 %v411_v28, %v437_v25 }
 0x243   :  { %v406_v31 = vsub.f32 %v378_v14, %v396_v29  ;;  %v405_v32 = vsel %vm404_vm11, %v402_v27, %v399_v26 }
 0x244   :  { %v407_v35 = vsub.f32 %v379_v30, %v405_v32 }
 0x245   :  { %v440_v36 = vadd.f32 %v438_v33, %v406_v31 }
 0x246   :  { %v441_v37 = vadd.f32 %v439_v34, %v407_v35 }
 0x248   :  { %v442_v38 = vadd.f32 %v441_v37, %v440_v36 }
 0x24a   :  { %v443_v39 = vrot.slane %v442_v38, 4 }
 0x24c   :  { %v444_v40 = vadd.f32 %v443_v39, %v442_v38 }
 0x24e   :  { %v445_v42 = vrot.slane %v444_v40, 2 }
 0x250   :  { %v446_v43 = vadd.f32 %v445_v42, %v444_v40 }
 0x252   :  { %v447_v44 = vrot.slane %v446_v43, 1 }
 0x254   :  { %v448_v41 = vadd.f32 %v447_v44, %v446_v43 }
 0x256   :  { %449 = vst [vmem:[#allocation2] sm:$0xff] %v448_v41 }
 0x257   :  { %621 = shalt.err (!%p618_p4)
}
 0x258   :  { %s622_s22 = scalar_lea.hbm %s827_s3, 128 }
 0x259   :  { %p623_p5 = scmp.ne.s32.totalorder %s827_s3, %s622_s22  ;;  %p626_p6 = scmp.lt.u32.totalorder %s622_s22, %s827_s3 }
 0x25b   :  { %p628_p7 = pnand %p626_p6, %p623_p5 }
 0x25d   :  { %631 = shalt.err (!%p628_p7)
}
 0x25e   :  { %459 = dma.vmem_to_hbm [thread:$0]  %s457_s2, 128, %s827_s3, [#allocation3]  }
 0x25f   :  { %632 = dma.done.wait [#allocation3], 128  }
 0x260   :  { %633 = vsyncadd [#allocation3], 4294967168 }
 0x261   :  { %463 = vsyncpa [#allocation3], 1 }

// kernel: tpu_custom_call.1
= control target key start
LH: loop header
LB: loop body
LE: loop exit
PB: predicated region body
PF: predicated region fallthrough
CT: control target
= control target key end

     0   :  { %v634_v1 = vmov 3   ;;  %v635_v2 = vmov 2   ;;  %v636_v4 = vmov 4   ;;  %s824_s0 = inlined_call_operand.vmem [shape: s32[16,10], index: 0, kind: input, shape index: {}]   ;;  %s825_s1 = inlined_call_operand.vmem [shape: bf16[128,32], index: 1, kind: input, shape index: {}]   ;;  %s826_s2 = inlined_call_operand.vmem [shape: bf16[128,32], index: 2, kind: input, shape index: {}]   ;;  %s827_s3 = inlined_call_operand.hbm [shape: f32[1,8,128], index: 3, kind: output, shape index: {}]  }
   0x1   :  { %v671_v0 = vld [vmem:[%s824_s0] sm:$0xff]  ;;  %562 = vset.pattern.permute.xlu1 %v634_v1  ;;  %561 = vset.pattern.permute.xlu0 %v635_v2  ;;  %v678_v3 = vld [vmem:[%s824_s0 + $0x8] sm:$0xff] }
   0x2   :  { %57 = vperm.xlu1 %562, %v671_v0   ;;  %47 = vperm.xlu0 %561, %v671_v0  }
   0x6   :  { %60 = vperm.xlu1 %562, %v678_v3   ;;  %50 = vperm.xlu0 %561, %v678_v3  }
   0xa   :  { %564 = vset.pattern.permute.xlu1 %v636_v4  ;;  %563 = vset.pattern.permute.xlu0 %v636_v4 }
   0xb   :  { %72 = vperm.xlu1 %564, %v678_v3   ;;  %69 = vperm.xlu0 %563, %v671_v0  }
   0xc   :  { %8 = vsyncpa [#allocation3], 0  ;;  %v637_v5 = vmov 5   ;;  %v578_v6 = vld [vmem:[%s826_s2] sm:$0xff]   ;;  %v638_v7 = vmov 6   ;;  %v639_v8 = vmov 7   ;;  %v18_v35 = vlaneseq }
   0xd   :  { %527 = vmatprep.subr.bf16.mxu1 %v578_v6  ;;  %v579_v9 = vld [vmem:[%s826_s2 + $0x8] sm:$0xff]   ;;  %v580_v10 = vld [vmem:[%s825_s1] sm:$0xff]   ;;  %v640_v11 = vmov 0.0   ;;  %v641_v12 = vmov 8   ;;  %v581_v13 = vld [vmem:[%s826_s2 + $0x10] sm:$0xff]   ;;  %v642_v15 = vmov 1  }
   0xe   :  { %528 = vmatpush3.bf16.msra.mxu1 %v578_v6  ;;  %507 = vmatprep.subr.bf16.mxu0 %v640_v11  ;;  %v582_v14 = vld [vmem:[%s825_s1 + $0x8] sm:$0xff]   ;;  %v583_v16 = vld [vmem:[%s826_s2 + $0x18] sm:$0xff]   ;;  %v584_v17 = vld [vmem:[%s825_s1 + $0x10] sm:$0xff]   ;;  %v643_v19 = vmov 0   ;;  %v644_v22 = vmov 9   ;;  %vm645_vm0 = vmmov 0  }
   0xf   :  { %565 = vset.pattern.permute.xlu1 %v637_v5  ;;  %566 = vset.pattern.permute.xlu0 %v637_v5  ;;  %v585_v18 = vld [vmem:[%s826_s2 + $0x20] sm:$0xff]   ;;  %v586_v20 = vld [vmem:[%s825_s1 + $0x18] sm:$0xff]   ;;  %v587_v21 = vld [vmem:[%s826_s2 + $0x28] sm:$0xff]   ;;  %v757_v36 = vand.u32 127, %v18_v35 }
  0x10   :  { %81 = vperm.xlu1 %565, %v671_v0   ;;  %84 = vperm.xlu0 %566, %v678_v3   ;;  %v588_v23 = vld [vmem:[%s825_s1 + $0x20] sm:$0xff]   ;;  %v589_v24 = vld [vmem:[%s826_s2 + $0x30] sm:$0xff]   ;;  %v590_v25 = vld [vmem:[%s825_s1 + $0x28] sm:$0xff]  }
  0x11   :  { %529 = vmatprep.subr.bf16.mxu1 %v579_v9  ;;  %508 = vmatpush3.bf16.msra.mxu0 %v580_v10  ;;  %v591_v26 = vld [vmem:[%s826_s2 + $0x38] sm:$0xff]   ;;  %v592_v27 = vld [vmem:[%s825_s1 + $0x30] sm:$0xff]  }
  0x12   :  { %530 = vmatpush3.bf16.msra.mxu1 %v579_v9  ;;  %509 = vmatprep.subr.bf16.mxu0 %v640_v11  ;;  %v593_v28 = vld [vmem:[%s825_s1 + $0x38] sm:$0xff]   ;;  %s647_s1 = smov [#allocation2]  }
  0x13   :  { %531 = vmatprep.subr.bf16.mxu1 %v581_v13  ;;  %523 = vmatprep.mubr.msk.bf16.mxu0 %vm645_vm0, %v640_v11  ;;  %s456_s2 = sshll.u32 %s647_s1, 4  ;;  %s457_s2 = int_to_ptr.vmem [resolvable:$true] %s456_s2 }
  0x14   :  { %567 = vset.pattern.permute.xlu1 %v638_v7  ;;  %568 = vset.pattern.permute.xlu0 %v639_v8  ;;  %s610_s19 = scalar_lea.vmem %s457_s2, 128  ;;  %p615_p1 = scmp.lt.s32.totalorder %s457_s2, %s457_s2 }
  0x15   :  { %93 = vperm.xlu1 %567, %v671_v0   ;;  %105 = vperm.xlu0 %568, %v671_v0   ;;  %p611_p0 = scmp.ne.s32.totalorder %s457_s2, %s610_s19  ;;  %p616_p2 = scmp.lt.s32.totalorder %s610_s19, %s610_s19 }
  0x16   :  { %510 = vmatpush3.bf16.msra.mxu0 %v582_v14  ;;  %532 = vmatpush3.bf16.msra.mxu1 %v581_v13 }
  0x17   :  { %511 = vmatprep.subr.bf16.mxu0 %v640_v11  ;;  %533 = vmatprep.subr.bf16.mxu1 %v583_v16  ;;  %p617_p3 = por %p616_p2, %p615_p1 }
  0x19   :  { %96 = vperm.xlu1 %567, %v678_v3   ;;  %571 = vset.pattern.permute.xlu0 %v641_v12  ;;  %p618_p4 = pnand %p617_p3, %p611_p0 }
  0x1a   :  { %120 = vperm.xlu0 %571, %v678_v3   ;;  %512 = vmatpush3.bf16.msra.mxu0 %v584_v17 }
  0x1b   :  { %534 = vmatpush3.bf16.msra.mxu1 %v583_v16  ;;  %513 = vmatprep.subr.bf16.mxu0 %v640_v11 }
  0x1c   :  { %535 = vmatprep.subr.bf16.mxu1 %v585_v18 }
  0x1d   :  { %569 = vset.pattern.permute.xlu1 %v639_v8 }
  0x1e   :  { %108 = vperm.xlu1 %569, %v678_v3   ;;  %573 = vset.pattern.permute.xlu0 %v642_v15 }
  0x1f   :  { %34 = vperm.xlu0 %573, %v671_v0   ;;  %514 = vmatpush3.bf16.msra.mxu0 %v586_v20  ;;  %v646_v20 = vmov 1.0|1.0  }
  0x20   :  { %536 = vmatpush3.bf16.msra.mxu1 %v585_v18  ;;  %515 = vmatprep.subr.bf16.mxu0 %v640_v11 }
  0x21   :  { %537 = vmatprep.subr.bf16.mxu1 %v587_v21 }
  0x22   :  { %570 = vset.pattern.permute.xlu1 %v641_v12 }
  0x23   :  { %117 = vperm.xlu1 %570, %v671_v0   ;;  %576 = vset.pattern.permute.xlu0 %v643_v19 }
  0x24   :  { %24 = vperm.xlu0 %576, %v678_v3   ;;  %516 = vmatpush3.bf16.msra.mxu0 %v588_v23 }
  0x25   :  { %538 = vmatpush3.bf16.msra.mxu1 %v587_v21  ;;  %517 = vmatprep.subr.bf16.mxu0 %v640_v11 }
  0x26   :  { %539 = vmatprep.subr.bf16.mxu1 %v589_v24 }
  0x27   :  { %572 = vset.pattern.permute.xlu1 %v644_v22 }
  0x28   :  { %129 = vperm.xlu1 %572, %v671_v0   ;;  %577 = vset.pattern.permute.xlu0 %v644_v22 }
  0x29   :  { %518 = vmatpush3.bf16.msra.mxu0 %v590_v25  ;;  %540 = vmatpush3.bf16.msra.mxu1 %v589_v24 }
  0x2a   :  { %519 = vmatprep.subr.bf16.mxu0 %v640_v11  ;;  %541 = vmatprep.subr.bf16.mxu1 %v591_v26 }
  0x2c   :  { %132 = vperm.xlu1 %572, %v678_v3  }
  0x2d   :  { %520 = vmatpush3.bf16.msra.mxu0 %v592_v27  ;;  %542 = vmatpush3.bf16.msra.mxu1 %v591_v26 }
  0x2e   :  { %521 = vmatprep.subr.bf16.mxu0 %v640_v11 }
  0x30   :  { %574 = vset.pattern.permute.xlu1 %v642_v15 }
  0x31   :  { %37 = vperm.xlu1 %574, %v678_v3   ;;  %522 = vmatpush3.bf16.msra.mxu0 %v593_v28 }
  0x35   :  { %575 = vset.pattern.permute.xlu1 %v643_v19 }
  0x36   :  { %21 = vperm.xlu1 %575, %v671_v0  }
  0x81   :  { %v58_v29 = vpop.permute.xlu1 %57  ;;  %v48_v31 = vpop.permute.xlu0 %47 }
  0x82   :  { %vm62_vm1 = vcmp.eq.s32.totalorder %v58_v29, %v757_v36  ;;  %vm52_vm2 = vcmp.eq.s32.totalorder %v48_v31, %v757_v36 }
  0x83   :  { %v64_v40 = vsel %vm62_vm1, 1, %v643_v19  ;;  %v54_v41 = vsel %vm52_vm2, 1, %v643_v19 }
  0x84   :  { %v66_v47 = vadd.s32 %v64_v40, %v54_v41 }
  0x85   :  { %v61_v30 = vpop.permute.xlu1 %60  ;;  %v51_v33 = vpop.permute.xlu0 %50 }
  0x86   :  { %vm63_vm3 = vcmp.eq.s32.totalorder %v61_v30, %v757_v36  ;;  %vm53_vm4 = vcmp.eq.s32.totalorder %v51_v33, %v757_v36 }
  0x87   :  { %v65_v43 = vsel %vm63_vm3, 1, %v643_v19  ;;  %v55_v44 = vsel %vm53_vm4, 1, %v643_v19 }
  0x88   :  { %v67_v51 = vadd.s32 %v65_v43, %v55_v44 }
  0x8a   :  { %v73_v32 = vpop.permute.xlu1 %72  ;;  %v70_v38 = vpop.permute.xlu0 %69 }
  0x8b   :  { %vm74_vm5 = vcmp.eq.s32.totalorder %v70_v38, %v757_v36  ;;  %vm75_vm6 = vcmp.eq.s32.totalorder %v73_v32, %v757_v36 }
  0x8c   :  { %v76_v45 = vsel %vm74_vm5, 1, %v643_v19  ;;  %v77_v48 = vsel %vm75_vm6, 1, %v643_v19 }
  0x8d   :  { %v78_v52 = vadd.s32 %v76_v45, %v66_v47  ;;  %v79_v55 = vadd.s32 %v77_v48, %v67_v51 }
  0x8f   :  { %v82_v34 = vpop.permute.xlu1 %81  ;;  %v85_v42 = vpop.permute.xlu0 %84 }
  0x90   :  { %vm86_vm7 = vcmp.eq.s32.totalorder %v82_v34, %v757_v36  ;;  %vm87_vm8 = vcmp.eq.s32.totalorder %v85_v42, %v757_v36 }
  0x91   :  { %v88_v49 = vsel %vm86_vm7, 1, %v643_v19  ;;  %v89_v53 = vsel %vm87_vm8, 1, %v643_v19  ;;  %vm363_vm7 = vcmask 261120  }
  0x92   :  { %v90_v56 = vadd.s32 %v88_v49, %v78_v52  ;;  %v91_v60 = vadd.s32 %v89_v53, %v79_v55 }
  0x94   :  { %v94_v37 = vpop.permute.xlu1 %93  ;;  %v106_v50 = vpop.permute.xlu0 %105 }
  0x95   :  { %vm98_vm9 = vcmp.eq.s32.totalorder %v94_v37, %v757_v36  ;;  %vm110_vm11 = vcmp.eq.s32.totalorder %v106_v50, %v757_v36 }
  0x96   :  { %v100_v54 = vsel %vm98_vm9, 1, %v643_v19  ;;  %v112_v62 = vsel %vm110_vm11, 1, %v643_v19 }
  0x97   :  { %v102_v61 = vadd.s32 %v100_v54, %v90_v56 }
  0x98   :  { %v97_v39 = vpop.permute.xlu1 %96 }
  0x99   :  { %vm99_vm10 = vcmp.eq.s32.totalorder %v97_v39, %v757_v36  ;;  %v121_v59 = vpop.permute.xlu0 %120  ;;  %v114_v3 = vadd.s32 %v112_v62, %v102_v61 }
  0x9a   :  { %v101_v58 = vsel %vm99_vm10, 1, %v643_v19  ;;  %vm123_vm14 = vcmp.eq.s32.totalorder %v121_v59, %v757_v36 }
  0x9b   :  { %v103_v0 = vadd.s32 %v101_v58, %v91_v60  ;;  %v125_v5 = vsel %vm123_vm14, 1, %v643_v19 }
  0x9d   :  { %v109_v46 = vpop.permute.xlu1 %108 }
  0x9e   :  { %vm111_vm12 = vcmp.eq.s32.totalorder %v109_v46, %v757_v36  ;;  %v35_v9 = vpop.permute.xlu0 %34 }
  0x9f   :  { %v113_v63 = vsel %vm111_vm12, 1, %v643_v19  ;;  %vm39_vm1 = vcmp.eq.s32.totalorder %v35_v9, %v757_v36 }
  0xa0   :  { %v115_v4 = vadd.s32 %v113_v63, %v103_v0 }
  0xa2   :  { %v118_v57 = vpop.permute.xlu1 %117  ;;  %v127_v10 = vadd.s32 %v125_v5, %v115_v4 }
  0xa3   :  { %vm122_vm13 = vcmp.eq.s32.totalorder %v118_v57, %v757_v36  ;;  %v25_v17 = vpop.permute.xlu0 %24 }
  0xa4   :  { %v124_v1 = vsel %vm122_vm13, 1, %v643_v19  ;;  %vm27_vm4 = vcmp.eq.s32.totalorder %v25_v17, %v757_v36 }
  0xa5   :  { %v126_v7 = vadd.s32 %v124_v1, %v114_v3 }
  0xa7   :  { %v130_v2 = vpop.permute.xlu1 %129 }
  0xa8   :  { %vm134_vm15 = vcmp.eq.s32.totalorder %v130_v2, %v757_v36 }
  0xa9   :  { %v136_v6 = vsel %vm134_vm15, 1, %v643_v19 }
  0xaa   :  { %v138_v11 = vadd.s32 %v136_v6, %v126_v7 }
  0xab   :  { %v133_v8 = vpop.permute.xlu1 %132 }
  0xac   :  { %vm135_vm0 = vcmp.eq.s32.totalorder %v133_v8, %v757_v36  ;;  %v140_v14 = vcvt.s32.f32 %v138_v11 }
  0xad   :  { %v137_v12 = vsel %vm135_vm0, 1, %v643_v19 }
  0xae   :  { %v139_v13 = vadd.s32 %v137_v12, %v127_v10 }
  0xb0   :  { %v141_v15 = vcvt.s32.f32 %v139_v13  ;;  %v38_v16 = vpop.permute.xlu1 %37 }
  0xb1   :  { %vm40_vm2 = vcmp.eq.s32.totalorder %v38_v16, %v757_v36 }
  0xb2   :  { %vm486_vm3 = vmpackc.low %vm40_vm2, %vm39_vm1  ;;  %v142_v18 = vpack.c.bf16 %v141_v15, %v140_v14 }
  0xb3   :  { %543 = vmatprep.mubr.msk.bf16.mxu1 %vm486_vm3, %v646_v20 }
  0xb4   :  { %544 = vmatmul.mubr.bf16.vlgmr.msra.gmra.mrb[0].mxu1 %v142_v18 }
  0xb5   :  { %v22_v21 = vpop.permute.xlu1 %21 }
  0xb6   :  { %vm26_vm5 = vcmp.eq.s32.totalorder %v22_v21, %v757_v36 }
  0xb7   :  { %vm476_vm6 = vmpackc.low %vm27_vm4, %vm26_vm5 }
  0xb8   :  { %524 = vmatmul.mubr.msk.bf16.vlgmr.msra.gmra.mrb[0].mxu0 %vm476_vm6, %v646_v20 }
 0x187   :  { %v545_v19 = vpop.f32.mrb[0].mxu1 }
 0x188   :  { %v346_v22 = vpop.f32.mrb[1].mxu1 }
 0x189   :  { %v546_v23 = vpop.f32.mrb[2].mxu1 }
 0x18a   :  { %v349_v24 = vpop.f32.mrb[3].mxu1 }
 0x18b   :  { %v257_v25 = vpop.f32.mrb[0].mxu0 }
 0x18c   :  { %v361_v26 = vmul.f32 %v346_v22, %v257_v25  ;;  %v370_v27 = vmul.f32 %v545_v19, %v257_v25  ;;  %v525_v28 = vpop.f32.mrb[1].mxu0 }
 0x18d   :  { %v260_v29 = vpop.f32.mrb[2].mxu0 }
 0x18e   :  { %v362_v30 = vmul.f32 %v349_v24, %v260_v29  ;;  %v371_v31 = vmul.f32 %v546_v23, %v260_v29  ;;  %v526_v32 = vpop.f32.mrb[3].mxu0  ;;  %v372_v33 = vsel %vm363_vm7, %v370_v27, 0.0  ;;  %v364_v35 = vsel %vm363_vm7, %v361_v26, 0.0 }
 0x18f   :  { %373 = vadd.xlane.f32.xlu1 %v372_v33 }
 0x190   :  { %v375_v34 = vsel %vm363_vm7, %v371_v31, 0.0  ;;  %v367_v36 = vsel %vm363_vm7, %v362_v30, 0.0 }
 0x191   :  { %376 = vadd.xlane.f32.xlu0 %v375_v34 }
 0x193   :  { %365 = vadd.xlane.f32.xlu1 %v364_v35 }
 0x195   :  { %368 = vadd.xlane.f32.xlu0 %v367_v36 }
 0x21c   :  { %v374_v37 = vpop.xlane.xlu1 %373 }
 0x21d   :  { %v408_v38 = vsub.f32 0.0, %v374_v37 }
 0x21e   :  { %v795_v39 = vpop.xlane.xlu0 %376 }
 0x21f   :  { %v412_v40 = vand.u32 2147483647, %v408_v38  ;;  %v409_v41 = vsub.f32 0.0, %v795_v39  ;;  %v410_v13 = vmin.f32 %v408_v38, 0.0 }
 0x220   :  { %v798_v42 = vpop.xlane.xlu1 %365 }
 0x221   :  { %v414_v43 = vsub.f32 0.0, %v412_v40  ;;  %v413_v44 = vand.u32 2147483647, %v409_v41  ;;  %v380_v45 = vand.u32 2147483647, %v798_v42  ;;  %v378_v14 = vmin.f32 %v798_v42, 0.0 }
 0x222   :  { %v801_v46 = vpop.xlane.xlu0 %368  ;;  %v411_v28 = vmin.f32 %v409_v41, 0.0 }
 0x223   :  { %v416_v47 = vmul.f32 1.442695, %v414_v43  ;;  %v415_v48 = vsub.f32 0.0, %v413_v44  ;;  %v381_v49 = vand.u32 2147483647, %v801_v46  ;;  %v382_v50 = vsub.f32 0.0, %v380_v45 }
 0x224   :  { %v379_v30 = vmin.f32 %v801_v46, 0.0 }
 0x225   :  { %594 = vpow2.f32 %v416_v47  ;;  %v418_v51 = vmul.f32 1.442695, %v415_v48  ;;  %v383_v52 = vsub.f32 0.0, %v381_v49  ;;  %v384_v53 = vmul.f32 1.442695, %v382_v50 }
 0x227   :  { %596 = vpow2.f32 %v418_v51  ;;  %v386_v54 = vmul.f32 1.442695, %v383_v52 }
 0x228   :  { %598 = vpow2.f32 %v384_v53 }
 0x229   :  { %600 = vpow2.f32 %v386_v54 }
 0x22f   :  { %v595_v55 = vpop.eup %594 }
 0x230   :  { %v420_v56 = vadd.f32 1.0, %v595_v55  ;;  %v423_v63 = vmul.f32 -0.5, %v595_v55  ;;  %v426_v4 = vand.u32 2147483647, %v595_v55 }
 0x231   :  { %v597_v57 = vpop.eup %596 }
 0x232   :  { %v599_v58 = vpop.eup %598  ;;  %602 = vlog2.f32 %v420_v56  ;;  %v429_v59 = vadd.f32 1.0, %v597_v57  ;;  %v432_v0 = vmul.f32 -0.5, %v597_v57  ;;  %v424_v3 = vadd.f32 1.0, %v423_v63 }
 0x233   :  { %v601_v60 = vpop.eup %600  ;;  %v388_v61 = vadd.f32 1.0, %v599_v58  ;;  %v391_v1 = vmul.f32 -0.5, %v599_v58  ;;  %v435_v7 = vand.u32 2147483647, %v597_v57  ;;  %v394_v9 = vand.u32 2147483647, %v599_v58 }
 0x234   :  { %604 = vlog2.f32 %v429_v59  ;;  %v397_v62 = vadd.f32 1.0, %v601_v60  ;;  %v400_v2 = vmul.f32 -0.5, %v601_v60  ;;  %v433_v5 = vadd.f32 1.0, %v432_v0 }
 0x235   :  { %606 = vlog2.f32 %v388_v61  ;;  %v392_v8 = vadd.f32 1.0, %v391_v1  ;;  %v403_v15 = vand.u32 2147483647, %v601_v60  ;;  %v425_v17 = vmul.f32 %v595_v55, %v424_v3 }
 0x236   :  { %608 = vlog2.f32 %v397_v62  ;;  %v401_v11 = vadd.f32 1.0, %v400_v2  ;;  %vm805_vm8 = vcmp.lt.f32.partialorder %v426_v4, 0.0004427343  ;;  %v434_v21 = vmul.f32 %v597_v57, %v433_v5 }
 0x237   :  { %vm436_vm9 = vcmp.lt.f32.partialorder %v435_v7, 0.0004427343  ;;  %v393_v23 = vmul.f32 %v599_v58, %v392_v8  ;;  %vm395_vm10 = vcmp.lt.f32.partialorder %v394_v9, 0.0004427343  ;;  %vm404_vm11 = vcmp.lt.f32.partialorder %v403_v15, 0.0004427343 }
 0x238   :  { %v402_v27 = vmul.f32 %v601_v60, %v401_v11 }
 0x23c   :  { %v603_v6 = vpop.eup %602 }
 0x23d   :  { %v422_v10 = vmul.f32 0.6931472, %v603_v6 }
 0x23e   :  { %v605_v12 = vpop.eup %604 }
 0x23f   :  { %v607_v16 = vpop.eup %606  ;;  %v431_v20 = vmul.f32 0.6931472, %v605_v12  ;;  %v428_v24 = vsel %vm805_vm8, %v425_v17, %v422_v10 }
 0x240   :  { %v609_v19 = vpop.eup %608  ;;  %v390_v22 = vmul.f32 0.6931472, %v607_v16  ;;  %v438_v33 = vsub.f32 %v410_v13, %v428_v24 }
 0x241   :  { %v437_v25 = vsel %vm436_vm9, %v434_v21, %v431_v20  ;;  %v399_v26 = vmul.f32 0.6931472, %v609_v19 }
 0x242   :  { %v396_v29 = vsel %vm395_vm10, %v393_v23, %v390_v22  ;;  %v439_v34 = vsub.f32 %v411_v28, %v437_v25 }
 0x243   :  { %v406_v31 = vsub.f32 %v378_v14, %v396_v29  ;;  %v405_v32 = vsel %vm404_vm11, %v402_v27, %v399_v26 }
 0x244   :  { %v407_v35 = vsub.f32 %v379_v30, %v405_v32 }
 0x245   :  { %v440_v36 = vadd.f32 %v438_v33, %v406_v31 }
 0x246   :  { %v441_v37 = vadd.f32 %v439_v34, %v407_v35 }
 0x248   :  { %v442_v38 = vadd.f32 %v441_v37, %v440_v36 }
 0x24a   :  { %v443_v39 = vrot.slane %v442_v38, 4 }
 0x24c   :  { %v444_v40 = vadd.f32 %v443_v39, %v442_v38 }
 0x24e   :  { %v445_v42 = vrot.slane %v444_v40, 2 }
 0x250   :  { %v446_v43 = vadd.f32 %v445_v42, %v444_v40 }
 0x252   :  { %v447_v44 = vrot.slane %v446_v43, 1 }
 0x254   :  { %v448_v41 = vadd.f32 %v447_v44, %v446_v43 }
 0x256   :  { %449 = vst [vmem:[#allocation2] sm:$0xff] %v448_v41 }
 0x257   :  { %621 = shalt.err (!%p618_p4)
}
 0x258   :  { %s622_s22 = scalar_lea.hbm %s827_s3, 128 }
 0x259   :  { %p623_p5 = scmp.ne.s32.totalorder %s827_s3, %s622_s22  ;;  %p626_p6 = scmp.lt.u32.totalorder %s622_s22, %s827_s3 }
 0x25b   :  { %p628_p7 = pnand %p626_p6, %p623_p5 }
 0x25d   :  { %631 = shalt.err (!%p628_p7)
}
 0x25e   :  { %459 = dma.vmem_to_hbm [thread:$0]  %s457_s2, 128, %s827_s3, [#allocation3]  }
 0x25f   :  { %632 = dma.done.wait [#allocation3], 128  }
 0x260   :  { %633 = vsyncadd [#allocation3], 4294967168 }
 0x261   :  { %463 = vsyncpa [#allocation3], 1 }

</bundles_post_ra>
